<compile_context>
chip_gen: v5e
topology: v5e:2x2
jax: 0.10.0
libtpu: 0.0.40
codegen_flags: <defaults>
</compile_context>

<pallas_src>
import functools

import jax
import jax.numpy as jnp
from jax import lax
from jax.experimental import pallas as pl
from jax.experimental.pallas import tpu as pltpu

_EPS = 1e-12          # F.normalize default eps
_EPS2 = _EPS * _EPS   # clamp on sum-of-squares == max(||x||, eps)


# ---------------------------------------------------------------------------
# In-kernel helpers
# ---------------------------------------------------------------------------
def _normalize_rows(x):
    """Row-wise L2 normalize (f32, rsqrt -> EUP slot)."""
    sumsq = jnp.sum(x * x, axis=-1, keepdims=True)
    return x * lax.rsqrt(jnp.maximum(sumsq, _EPS2))


def _softmax_over_k(logits, out_ref):
    """Softmax along K (axis 0) of a (K, TN) tile; exact reciprocal (K tiny)."""
    logits = logits - jnp.max(logits, axis=0, keepdims=True)
    e = jnp.exp(logits)
    out_ref[...] = (e / jnp.sum(e, axis=0, keepdims=True)).astype(out_ref.dtype)


# ---------------------------------------------------------------------------
# Main attention-pooling kernels (1-D grid over N query tiles)
# ---------------------------------------------------------------------------
def _attn_pool_avg_kernel(kred_ref, x_ref, out_ref):
    # kred_ref: (K, D) resident, already mean-over-M * (1/sqrt(D)) * (1/temp).
    # x_ref: (TN, D); out_ref: (K, TN).
    qn = _normalize_rows(x_ref[...].astype(jnp.float32))               # (TN, D)
    # (K, D) x (TN, D) contracted on D -> (K, TN): no in-kernel transpose,
    # lane-dense stores along N.
    logits = lax.dot_general(kred_ref[...], qn,
                             (((1,), (1,)), ((), ())),
                             preferred_element_type=jnp.float32)       # (K, TN)
    _softmax_over_k(logits, out_ref)


def _attn_pool_max_kernel(kflat_ref, x_ref, out_ref, *, num_keys, rows_per_key):
    # kflat_ref: (K*M, D) resident, already * (1/sqrt(D)) * (1/temp).
    # x_ref: (TN, D); out_ref: (K, TN).
    qn = _normalize_rows(x_ref[...].astype(jnp.float32))               # (TN, D)
    # Single MXU push for all keys.
    s = lax.dot_general(kflat_ref[...], qn,
                        (((1,), (1,)), ((), ())),
                        preferred_element_type=jnp.float32)            # (K*M, TN)
    s = s.reshape(num_keys, rows_per_key, s.shape[-1])                 # (K, M, TN)
    logits = jnp.max(s, axis=1)                                        # (K, TN)
    _softmax_over_k(logits, out_ref)


# ---------------------------------------------------------------------------
# Wrapper
# ---------------------------------------------------------------------------
def _pick_query_tile(n):
    """Largest multiple-of-128 tile (<=512) that still leaves >=2 grid steps
    (keeps the v7x 2-TensorCore split alive); single tile if N <= 128."""
    if n <= 128:
        return n
    for cand in (512, 384, 256, 128):
        if pl.cdiv(n, cand) >= 2:
            return cand
    return 128


def attention_pooling_fraction(x, X, *, block, pool_type="avg", temperature=0.5):
    """JAX/Pallas equivalent of Attentionpoolingfraction.forward.

    x: (N, D) query tensor.
    X: tuple of arrays, each (M, S, D) with S >= 2 (readout-block axis).
    Returns delta.T of shape (len(X), N), matching the PyTorch module.
    """
    if block == "LinearReadoutBlock":
        idx = 0
    elif block == "NonLinearReadoutBlock":
        idx = 1
    else:
        raise ValueError("Invalid block")
    if pool_type not in ("avg", "max"):
        raise ValueError(f"Invalid pool_type: {pool_type}. Choose 'avg' or 'max'.")

    x = jnp.asarray(x, dtype=jnp.float32)
    K = len(X)
    M, _, D = X[0].shape
    N = x.shape[0]
    # Fold the 1/sqrt(D) score scale AND 1/temperature into the keys
    # (exact: avg is linear; max commutes with a positive scale).
    scale = (1.0 / (D ** 0.5)) * (1.0 / temperature)

    # ---- key preprocessing in plain jnp (tiny: K*M*D elements) --------------
    keys = jnp.stack([jnp.asarray(Xi, dtype=jnp.float32)[:, idx, :] for Xi in X],
                     axis=0)                                            # (K, M, D)
    kn = _normalize_rows(keys)                                          # (K, M, D)
    if pool_type == "avg":
        kprep = jnp.mean(kn, axis=1) * scale                            # (K, D)
        main_kernel = _attn_pool_avg_kernel
        kprep_spec = pl.BlockSpec((K, D), lambda i: (0, 0))             # resident
        flops_mm = 2 * N * K * D
    else:
        kprep = (kn * scale).reshape(K * M, D)                          # (K*M, D)
        main_kernel = functools.partial(
            _attn_pool_max_kernel, num_keys=K, rows_per_key=M)
        kprep_spec = pl.BlockSpec((K * M, D), lambda i: (0, 0))         # resident
        flops_mm = 2 * N * K * M * D

    # ---- main kernel: grid over N, (K, N)-major output ----------------------
    TN = _pick_query_tile(N)
    grid = (pl.cdiv(N, TN),)

    cost = pl.CostEstimate(
        flops=int(flops_mm + 4 * N * D + 6 * N * K),
        transcendentals=int(N * (K + 1)),                 # exp per (k, n) + rsqrt per n
        bytes_accessed=int(N * D * 4 + kprep.size * 4 + K * N * 4),
    )

    out = pl.pallas_call(
        main_kernel,
        out_shape=jax.ShapeDtypeStruct((K, N), jnp.float32),
        grid=grid,
        in_specs=[kprep_spec,
                  pl.BlockSpec((TN, D), lambda i: (i, 0))],
        out_specs=pl.BlockSpec((K, TN), lambda i: (0, i)),
        compiler_params=pltpu.CompilerParams(
            dimension_semantics=("parallel",)),           # N tiles independent (v7x split)
        cost_estimate=cost,
    )(kprep, x)
    return out


# ---------------------------------------------------------------------------
# Pure-JAX reference (mirrors the PyTorch module) for the correctness check.
# ---------------------------------------------------------------------------
def _reference(x, X, *, block, pool_type="avg", temperature=0.5):
    eps = 1e-12
    idx = 0 if block == "LinearReadoutBlock" else 1
    q = x / jnp.maximum(jnp.linalg.norm(x, axis=-1, keepdims=True), eps)
    pooled = []
    for Xi in X:
        key = Xi[:, idx, :]
        key = key / jnp.maximum(jnp.linalg.norm(key, axis=-1, keepdims=True), eps)
        s = (q @ key.T) / (key.shape[-1] ** 0.5)
        if pool_type == "avg":
            ps = jnp.mean(s, axis=-1, keepdims=True)
        else:
            ps = jnp.max(s, axis=-1, keepdims=True)
        pooled.append(ps)
    pooled = jnp.concatenate(pooled, axis=-1)
    delta = jax.nn.softmax(pooled / temperature, axis=-1)
    return delta.T


if __name__ == "__main__":
    key = jax.random.PRNGKey(0)
    N, D = 256, 32    # query rows (2 grid steps of 128), feature dim
    M, S = 8, 2       # key rows per X tensor, readout-block axis
    K = 3             # number of X tensors passed to __init__

    ks = jax.random.split(key, K + 1)
    x = jax.random.normal(ks[0], (N, D), dtype=jnp.float32)
    X = tuple(jax.random.normal(k, (M, S, D), dtype=jnp.float32) for k in ks[1:])

    # avg pooling, linear readout block
    out_avg = attention_pooling_fraction(
        x, X, block="LinearReadoutBlock", pool_type="avg", temperature=0.5)
    out_avg = jax.block_until_ready(out_avg)
    ref_avg = _reference(x, X, block="LinearReadoutBlock", pool_type="avg",
                         temperature=0.5)
    assert out_avg.shape == (K, N)
    assert jnp.allclose(out_avg, ref_avg, atol=1e-2, rtol=1e-2)

    # max pooling, nonlinear readout block
    out_max = attention_pooling_fraction(
        x, X, block="NonLinearReadoutBlock", pool_type="max", temperature=0.5)
    out_max = jax.block_until_ready(out_max)
    ref_max = _reference(x, X, block="NonLinearReadoutBlock", pool_type="max",
                         temperature=0.5)
    assert out_max.shape == (K, N)
    assert jnp.allclose(out_max, ref_max, atol=1e-2, rtol=1e-2)

    print("KERNEL_OK")
</pallas_src>

<mosaic_0001>
module attributes {stable_mosaic.version = 11 : i64} {
  func.func @_attn_pool_avg_kernel(%arg0: i32, %arg1: memref<3x32xf32, #tpu.memory_space<vmem>>, %arg2: memref<128x32xf32, #tpu.memory_space<vmem>>, %arg3: memref<3x128xf32, #tpu.memory_space<vmem>>) attributes {dimension_semantics = [#tpu.dimension_semantics<parallel>], iteration_bounds = array<i64: 2>, scalar_prefetch = 0 : i64, scratch_operands = 0 : i64, tpu.core_type = #tpu.core_type<tc>, window_params = [{pipeline_mode = #tpu.pipeline_mode<synchronous>, transform_indices = @transform_0, window_bounds = array<i64: 3, 32>}, {transform_indices = @transform_1, window_bounds = array<i64: 128, 32>}, {transform_indices = @transform_2, window_bounds = array<i64: 3, 128>}]} {
    %c0 = arith.constant 0 : index
    %c0_0 = arith.constant 0 : index
    %0 = vector.load %arg2[%c0, %c0_0] : memref<128x32xf32, #tpu.memory_space<vmem>>, vector<128x32xf32>
    %1 = arith.mulf %0, %0 : vector<128x32xf32>
    %cst = arith.constant dense<0.000000e+00> : vector<128xf32>
    %2 = vector.multi_reduction <add>, %1, %cst [1] : vector<128x32xf32> to vector<128xf32>
    %3 = vector.shape_cast %2 : vector<128xf32> to vector<128x1xf32>
    %cst_1 = arith.constant 1.000000e-24 : f32
    %4 = vector.broadcast %cst_1 : f32 to vector<128x1xf32>
    %5 = arith.maximumf %3, %4 : vector<128x1xf32>
    %6 = math.rsqrt %5 : vector<128x1xf32>
    %7 = vector.broadcast %6 : vector<128x1xf32> to vector<128x32xf32>
    %8 = arith.mulf %0, %7 : vector<128x32xf32>
    %c0_2 = arith.constant 0 : index
    %c0_3 = arith.constant 0 : index
    %9 = vector.load %arg1[%c0_2, %c0_3] : memref<3x32xf32, #tpu.memory_space<vmem>>, vector<3x32xf32>
    %cst_4 = arith.constant dense<0.000000e+00> : vector<3x128xf32>
    %10 = tpu.matmul %9, %8, %cst_4 {dimension_numbers = #tpu.dot_dimension_numbers<[1], [1], [0], [0], [0, 0, 1, 0], [], []>} : vector<3x32xf32>, vector<128x32xf32>, vector<3x128xf32> -> vector<3x128xf32>
    %cst_5 = arith.constant dense<0xFF800000> : vector<128xf32>
    %11 = vector.multi_reduction <maximumf>, %10, %cst_5 [0] : vector<3x128xf32> to vector<128xf32>
    %12 = vector.shape_cast %11 : vector<128xf32> to vector<1x128xf32>
    %13 = vector.broadcast %12 : vector<1x128xf32> to vector<3x128xf32>
    %14 = arith.subf %10, %13 : vector<3x128xf32>
    %15 = math.exp %14 : vector<3x128xf32>
    %cst_6 = arith.constant dense<0.000000e+00> : vector<128xf32>
    %16 = vector.multi_reduction <add>, %15, %cst_6 [0] : vector<3x128xf32> to vector<128xf32>
    %17 = vector.shape_cast %16 : vector<128xf32> to vector<1x128xf32>
    %18 = vector.broadcast %17 : vector<1x128xf32> to vector<3x128xf32>
    %19 = arith.divf %15, %18 : vector<3x128xf32>
    %c0_7 = arith.constant 0 : index
    %c0_8 = arith.constant 0 : index
    %20 = vector.load %arg3[%c0_7, %c0_8] : memref<3x128xf32, #tpu.memory_space<vmem>>, vector<3x128xf32>
    tpu.vector_store %arg3[%c0_7, %c0_8], %19 {strides = array<i32>} : memref<3x128xf32, #tpu.memory_space<vmem>>, vector<3x128xf32>,
    return
  }
  func.func @transform_0(%arg0: i32) -> (i32, i32) {
    %c0_i32 = arith.constant 0 : i32
    %c0_i32_0 = arith.constant 0 : i32
    %c0_i32_1 = arith.constant 0 : i32
    return %c0_i32, %c0_i32_0 : i32, i32
  }
  func.func @transform_1(%arg0: i32) -> (i32, i32) {
    %c0_i32 = arith.constant 0 : i32
    %c0_i32_0 = arith.constant 0 : i32
    return %arg0, %c0_i32 : i32, i32
  }
  func.func @transform_2(%arg0: i32) -> (i32, i32) {
    %c0_i32 = arith.constant 0 : i32
    %c0_i32_0 = arith.constant 0 : i32
    return %c0_i32, %arg0 : i32, i32
  }
}

</mosaic_0001>

<bundles_post_ra>
// kernel: tpu_custom_call.1
= control target key start
LH: loop header
LB: loop body
LE: loop exit
PB: predicated region body
PF: predicated region fallthrough
CT: control target
= control target key end

     0   :  { %7 = vsyncpa [#allocation3], 0  ;;  %s1218_s0 = inlined_call_operand.vmem [shape: f32[3,32], index: 0, kind: input, shape index: {}]   ;;  %s1219_s1 = inlined_call_operand.vmem [shape: f32[256,32], index: 1, kind: input, shape index: {}]   ;;  %s1220_s2 = inlined_call_operand.hbm [shape: f32[3,256], index: 2, kind: output, shape index: {}]  }
   0x1   :  { %9 = vsyncpa [#allocation3 + $0x1], 0  ;;  %s780_s9 = smov 0   ;;  %s782_s10 = smov 0  }
   0x2   :  { %s784_s11 = smov 0   ;;  %s786_s12 = smov 0  }
   0x3 LB: > { %s801_s13 = sadd.s32 4294967295, %s763_s12   ;;  %s598_s14 = sadd.s32 4294967294, %s763_s12   ;;  %s763_s12 = sphi %s786_s12, %s1244_s12   ;;  %s759_s11 = sphi %s784_s11, %s1243_s11   ;;  %s755_s10 = sphi %s782_s10, %s1242_s10   ;;  %s751_s9 = sphi %s780_s9, %s1241_s9  }
   0x4   : > { %s805_s15 = sadd.s32 1, %s763_s12   ;;  %s69_s16 = sadd.s32 1, %s759_s11 }
   0x5   : > { %s66_s17 = ssub.s32 %s763_s12, %s805_s15  ;;  %p79_p0 = scmp.ne.s32.totalorder %s759_s11, %s755_s10 }
   0x6   : > { %p67_p1 = scmp.eq.s32.totalorder %s66_s17, 0  ;;  %p80_p2 = scmp.eq.s32.totalorder %s801_s13, 1 }
   0x7   : > { %p85_p3 = scmp.ne.s32.totalorder %s755_s10, %s751_s9  ;;  %p86_p4 = scmp.eq.s32.totalorder %s598_s14, 1 }
   0x8   : > { %s816_s18 = scalar_select %p67_p1, %s759_s11, %s69_s16  }
   0x9   : > { %p818_p5 = por %p80_p2, %p79_p0  ;;  %p822_p6 = por %p86_p4, %p85_p3 }
   0xa   : > { %p601_p7 = scmp.ge.s32.totalorder %s763_s12, 1  ;;  %p116_p8 = scmp.lt.s32.totalorder %s763_s12, 3 }
   0xc   : > { %p117_p9 = pnand %p601_p7, %p116_p8 }
   0xd   : > { %s603_s21 = sshll.u32 (!%p117_p9), %s801_s13, 4  ;;  %s135_s28 = sand.u32 (!%p117_p9), 1, %s755_s10  }
   0xe   : > { %120 = sbr.rel (%p117_p9) target bundleno = 416 (0x1a0), region = 28  ;;  %p139_p10 = scmp.lt.s32.totalorder (!%p117_p9), %s603_s21, 31 }
   0xf   : > { %s602_s29 = sshll.u32 (!%p117_p9), %s135_s28, 2  ;;  %s623_s30 = sshll.u32 (!%p117_p9), %s801_s13, 2 }
  0x10   : > { %s534_s5 = scalar_lea.hbm (!%p117_p9), %s1220_s2, %s623_s30  ;;  %s137_s6 = scalar_lea.vmem (!%p117_p9), [#allocation2], %s602_s29 }
  0x11   : > { %s536_s7 = sshll.u32 (!%p117_p9), %s137_s6, 4  ;;  %s538_s8 = sshll.u32 (!%p117_p9), %s534_s5, 4  ;;  %s537_s7 = int_to_ptr.vmem [resolvable:$true] %s536_s7  ;;  %s539_s8 = int_to_ptr.hbm [resolvable:$true] %s538_s8 }
  0x12   : > { %s524_s13 = scalar_lea.sflag (!%p117_p9), [#allocation3], %s135_s28  ;;  %s715_s14 = sshra.s32 (!%p117_p9), %s539_s8, 4  ;;  %s716_s14 = int_to_ptr.hbm [resolvable:$true] %s715_s14 }
  0x13   : > { %s1246_s21 = smov (!%p139_p10, %s603_s21), 31  ;;  %vm176_vm0 = vcmask 261120   ;;  %s717_s16 = scalar_lea.hbm %s716_s14, 4 }
  0x14   : > { %s604_s22 = sshll.u32 %s1246_s21, 3  ;;  %p718_p11 = scmp.ne.s32.totalorder %s716_s14, %s717_s16 }
  0x15   : > { %s832_s25 = scalar_lea.vmem %s1219_s1, %s604_s22  ;;  %s721_s22 = scalar_lea.hbm %s1220_s2, 8 }
  0x16   : > { %v835_v0 = vld [vmem:[%s832_s25 + $0x78] sm:$0xff]  ;;  %v838_v1 = vld [vmem:[%s832_s25 + $0x68] sm:$0xff]  ;;  %v850_v6 = vld [vmem:[%s832_s25 + $0x70] sm:$0xff]  ;;  %p719_p12 = pnand %p718_p11, %p818_p5  ;;  %p722_p0 = scmp.lt.s32.totalorder %s716_s14, %s1220_s2 }
  0x17   : > { %v841_v2 = vld [vmem:[%s832_s25 + $0x58] sm:$0xff]  ;;  %v175_v3 = vmul.f32 %v835_v0, %v835_v0  ;;  %v173_v4 = vmul.f32 %v838_v1, %v838_v1  ;;  %v853_v7 = vld [vmem:[%s832_s25 + $0x60] sm:$0xff]  ;;  %v859_v11 = vld [vmem:[%s832_s25 + $0x50] sm:$0xff]  ;;  %v174_v12 = vmul.f32 %v850_v6, %v850_v6  ;;  %p723_p1 = scmp.lt.s32.totalorder %s721_s22, %s717_s16 }
  0x18   : > { %v171_v5 = vmul.f32 %v841_v2, %v841_v2  ;;  %v172_v13 = vmul.f32 %v853_v7, %v853_v7  ;;  %v170_v14 = vmul.f32 %v859_v11, %v859_v11  ;;  %v871_v18 = vld [vmem:[%s832_s25 + $0x48] sm:$0xff]  ;;  %v874_v19 = vld [vmem:[%s832_s25 + $0x40] sm:$0xff]  ;;  %v877_v20 = vld [vmem:[%s832_s25 + $0x38] sm:$0xff]  ;;  %p720_p13 = pneg %p719_p12 }
  0x19   : > { %v222_v8 = vsel %vm176_vm0, %v175_v3, 0.0  ;;  %v216_v9 = vsel %vm176_vm0, %v173_v4, 0.0  ;;  %v219_v15 = vsel %vm176_vm0, %v174_v12, 0.0  ;;  %v169_v21 = vmul.f32 %v871_v18, %v871_v18  ;;  %v889_v27 = vld [vmem:[%s832_s25 + $0x30] sm:$0xff]  ;;  %v892_v28 = vld [vmem:[%s832_s25 + $0x28] sm:$0xff]  ;;  %v895_v29 = vld [vmem:[%s832_s25 + $0x20] sm:$0xff]  ;;  %p724_p2 = por %p723_p1, %p722_p0 }
  0x1a   : > { %v210_v10 = vsel %vm176_vm0, %v171_v5, 0.0  ;;  %223 = vadd.xlane.f32.xlu0 %v222_v8  ;;  %217 = vadd.xlane.f32.xlu1 %v216_v9  ;;  %v213_v16 = vsel %vm176_vm0, %v172_v13, 0.0  ;;  %v207_v17 = vsel %vm176_vm0, %v170_v14, 0.0  ;;  %v168_v22 = vmul.f32 %v874_v19, %v874_v19  ;;  %v907_v36 = vld [vmem:[%s832_s25 + $0x18] sm:$0xff]  ;;  %v910_v37 = vld [vmem:[%s832_s25 + $0x10] sm:$0xff]  ;;  %v913_v38 = vld [vmem:[%s832_s25 + $0x8] sm:$0xff] }
  0x1b   : > { %211 = vadd.xlane.f32.xlu2 %v210_v10  ;;  %v167_v23 = vmul.f32 %v877_v20, %v877_v20  ;;  %v204_v24 = vsel %vm176_vm0, %v169_v21, 0.0  ;;  %v166_v30 = vmul.f32 %v889_v27, %v889_v27  ;;  %v165_v31 = vmul.f32 %v892_v28, %v892_v28  ;;  %v925_v45 = vld [vmem:[%s832_s25] sm:$0xff]  ;;  %p725_p3 = pnand %p724_p2, %p720_p13 }
  0x1c   : > { %v201_v25 = vsel %vm176_vm0, %v168_v22, 0.0  ;;  %v164_v32 = vmul.f32 %v895_v29, %v895_v29  ;;  %v163_v39 = vmul.f32 %v907_v36, %v907_v36  ;;  %v162_v40 = vmul.f32 %v910_v37, %v910_v37 }
  0x1d   : > { %v198_v26 = vsel %vm176_vm0, %v167_v23, 0.0  ;;  %v195_v33 = vsel %vm176_vm0, %v166_v30, 0.0  ;;  %v192_v34 = vsel %vm176_vm0, %v165_v31, 0.0  ;;  %v161_v41 = vmul.f32 %v913_v38, %v913_v38 }
  0x1e   : > { %v189_v35 = vsel %vm176_vm0, %v164_v32, 0.0  ;;  %v186_v42 = vsel %vm176_vm0, %v163_v39, 0.0  ;;  %v183_v43 = vsel %vm176_vm0, %v162_v40, 0.0  ;;  %v160_v46 = vmul.f32 %v925_v45, %v925_v45 }
  0x1f   : > { %v180_v44 = vsel %vm176_vm0, %v161_v41, 0.0 }
  0x20   : > { %v177_v47 = vsel %vm176_vm0, %v160_v46, 0.0 }
  0x22   : > { %220 = vadd.xlane.f32.xlu0 %v219_v15  ;;  %214 = vadd.xlane.f32.xlu1 %v213_v16 }
  0x23   : > { %208 = vadd.xlane.f32.xlu2 %v207_v17 }
  0x2a   : > { %205 = vadd.xlane.f32.xlu0 %v204_v24  ;;  %202 = vadd.xlane.f32.xlu1 %v201_v25 }
  0x2b   : > { %199 = vadd.xlane.f32.xlu2 %v198_v26 }
  0x32   : > { %196 = vadd.xlane.f32.xlu0 %v195_v33  ;;  %193 = vadd.xlane.f32.xlu1 %v192_v34 }
  0x33   : > { %190 = vadd.xlane.f32.xlu2 %v189_v35 }
  0x3a   : > { %187 = vadd.xlane.f32.xlu0 %v186_v42  ;;  %184 = vadd.xlane.f32.xlu1 %v183_v43 }
  0x3b   : > { %181 = vadd.xlane.f32.xlu2 %v180_v44 }
  0x42   : > { %178 = vadd.xlane.f32.xlu0 %v177_v47 }
  0x8d   : > { %v224_v48 = vpop.xlane.xlu0 %223  ;;  %v218_v49 = vpop.xlane.xlu1 %217 }
  0x8e   : > { %v240_v50 = vmax.f32 %v224_v48, 1e-24  ;;  %v930_v51 = vmax.f32 %v218_v49, 1e-24  ;;  %v212_v52 = vpop.xlane.xlu2 %211 }
  0x8f   : > { %v933_v53 = vmax.f32 %v212_v52, 1e-24 }
  0x90   : > { %665 = vrsqrt.f32 %v240_v50  ;;  %vm397_vm2 = vweird.f32 %v240_v50  ;;  %vm377_vm4 = vweird.f32 %v930_v51 }
  0x91   : > { %667 = vrsqrt.f32 %v930_v51  ;;  %vm357_vm12 = vweird.f32 %v933_v53 }
  0x92   : > { %669 = vrsqrt.f32 %v933_v53 }
  0x95   : > { %v221_v54 = vpop.xlane.xlu0 %220  ;;  %v215_v55 = vpop.xlane.xlu1 %214 }
  0x96   : > { %v666_v56 = vpop.eup %665  ;;  %v239_v57 = vmax.f32 %v221_v54, 1e-24  ;;  %v936_v58 = vmax.f32 %v215_v55, 1e-24  ;;  %v209_v59 = vpop.xlane.xlu2 %208 }
  0x97   : > { %v938_v60 = vpop.eup %667  ;;  %v392_v61 = vmul.f32 %v666_v56, %v240_v50  ;;  %v940_v62 = vmax.f32 %v209_v59, 1e-24  ;;  %vm398_vm1 = vweird.f32 %v666_v56 }
  0x98   : > { %v372_v63 = vmul.f32 %v938_v60, %v930_v51  ;;  %671 = vrsqrt.f32 %v239_v57  ;;  %v945_v4 = vpop.eup %669  ;;  %vm399_vm3 = vmor %vm397_vm2, %vm398_vm1  ;;  %vm378_vm6 = vweird.f32 %v938_v60  ;;  %vm387_vm7 = vweird.f32 %v239_v57 }
  0x99   : > { %v393_v3 = vmul.f32 %v666_v56, %v392_v61  ;;  %673 = vrsqrt.f32 %v936_v58  ;;  %v352_v13 = vmul.f32 %v945_v4, %v933_v53  ;;  %vm367_vm9 = vweird.f32 %v936_v58  ;;  %vm991_vm10 = vmor %vm377_vm4, %vm378_vm6 }
  0x9a   : > { %675 = vrsqrt.f32 %v940_v62  ;;  %v373_v8 = vmul.f32 %v938_v60, %v372_v63  ;;  %vm358_vm13 = vweird.f32 %v945_v4  ;;  %vm347_vm1 = vweird.f32 %v940_v62 }
  0x9b   : > { %v394_v5 = vmul.f32 0.5, %v393_v3  ;;  %v353_v30 = vmul.f32 %v945_v4, %v352_v13  ;;  %vm1031_vm15 = vmor %vm357_vm12, %vm358_vm13 }
  0x9c   : > { %v374_v23 = vmul.f32 0.5, %v373_v8 }
  0x9d   : > { %v206_v9 = vpop.xlane.xlu0 %205  ;;  %v203_v10 = vpop.xlane.xlu1 %202  ;;  %v395_v17 = vsub.f32 1.5, %v394_v5  ;;  %v354_v46 = vmul.f32 0.5, %v353_v30 }
  0x9e   : > { %v672_v12 = vpop.eup %671  ;;  %v951_v14 = vmax.f32 %v206_v9, 1e-24  ;;  %v953_v15 = vmax.f32 %v203_v10, 1e-24  ;;  %v200_v22 = vpop.xlane.xlu2 %199  ;;  %v375_v35 = vsub.f32 1.5, %v374_v23 }
  0x9f   : > { %v955_v16 = vpop.eup %673  ;;  %v382_v21 = vmul.f32 %v672_v12, %v239_v57  ;;  %v965_v32 = vmax.f32 %v200_v22, 1e-24  ;;  %v396_v34 = vmul.f32 %v666_v56, %v395_v17  ;;  %vm388_vm5 = vweird.f32 %v672_v12 }
  0xa0   : > { %v362_v24 = vmul.f32 %v955_v16, %v936_v58  ;;  %677 = vrsqrt.f32 %v951_v14  ;;  %v960_v25 = vpop.eup %675  ;;  %v376_v59 = vmul.f32 %v938_v60, %v375_v35  ;;  %vm389_vm8 = vmor %vm387_vm7, %vm388_vm5  ;;  %v355_v61 = vsub.f32 1.5, %v354_v46 }
  0xa1   : > { %v383_v26 = vmul.f32 %v672_v12, %v382_v21  ;;  %679 = vrsqrt.f32 %v953_v15  ;;  %v342_v40 = vmul.f32 %v960_v25, %v940_v62  ;;  %v400_v42 = vsel %vm399_vm3, %v666_v56, %v396_v34 }
  0xa2   : > { %v363_v31 = vmul.f32 %v955_v16, %v362_v24  ;;  %681 = vrsqrt.f32 %v965_v32  ;;  %v416_v47 = vmul.f32 %v400_v42, %v835_v0  ;;  %vm368_vm11 = vweird.f32 %v955_v16 }
  0xa3   : > { %v384_v33 = vmul.f32 0.5, %v383_v26  ;;  %v343_v55 = vmul.f32 %v960_v25, %v342_v40  ;;  %v380_v51 = vsel %vm991_vm10, %v938_v60, %v376_v59  ;;  %vm1017_vm14 = vmor %vm367_vm9, %vm368_vm11  ;;  %v356_v58 = vmul.f32 %v945_v4, %v355_v61 }
  0xa4   : > { %v364_v39 = vmul.f32 0.5, %v363_v31  ;;  %605 = vmatpush.xpose.msk.msra.mxu0 %vm176_vm0, %v416_v47  ;;  %v414_v22 = vmul.f32 %v380_v51, %v838_v1  ;;  %vm348_vm2 = vweird.f32 %v960_v25  ;;  %vm337_vm4 = vweird.f32 %v951_v14 }
  0xa5   : > { %v385_v41 = vsub.f32 1.5, %v384_v33  ;;  %v197_v43 = vpop.xlane.xlu0 %196  ;;  %v194_v48 = vpop.xlane.xlu1 %193  ;;  %v344_v10 = vmul.f32 0.5, %v343_v55  ;;  %v360_v62 = vsel %vm1031_vm15, %v945_v4, %v356_v58  ;;  %vm1051_vm3 = vmor %vm347_vm1, %vm348_vm2  ;;  %vm327_vm6 = vweird.f32 %v953_v15 }
  0xa6   : > { %v970_v44 = vpop.eup %677  ;;  %v975_v49 = vmax.f32 %v197_v43, 1e-24  ;;  %v365_v54 = vsub.f32 1.5, %v364_v39  ;;  %v984_v0 = vmax.f32 %v194_v48, 1e-24  ;;  %v191_v8 = vpop.xlane.xlu2 %190  ;;  %v412_v4 = vmul.f32 %v360_v62, %v841_v2 }
  0xa7   : > { %v386_v50 = vmul.f32 %v672_v12, %v385_v41  ;;  %v977_v52 = vpop.eup %679  ;;  %v332_v56 = vmul.f32 %v970_v44, %v951_v14  ;;  %v345_v53 = vsub.f32 1.5, %v344_v10  ;;  %vm338_vm5 = vweird.f32 %v970_v44 }
  0xa8   : > { %v322_v3 = vmul.f32 %v977_v52, %v953_v15  ;;  %683 = vrsqrt.f32 %v975_v49  ;;  %v1000_v9 = vpop.eup %681  ;;  %v366_v13 = vmul.f32 %v955_v16, %v365_v54  ;;  %vm328_vm7 = vweird.f32 %v977_v52 }
  0xa9   : > { %v390_v57 = vsel %vm389_vm8, %v672_v12, %v386_v50  ;;  %v333_v12 = vmul.f32 %v970_v44, %v332_v56  ;;  %685 = vrsqrt.f32 %v984_v0  ;;  %v312_v21 = vmul.f32 %v1000_v9, %v965_v32  ;;  %vm1080_vm8 = vmor %vm337_vm4, %vm338_vm5 }
  0xaa   : > { %v415_v5 = vmul.f32 %v390_v57, %v850_v6  ;;  %v1011_v6 = vmax.f32 %v191_v8, 1e-24  ;;  %v323_v60 = vmul.f32 %v977_v52, %v322_v3  ;;  %v370_v26 = vsel %vm1017_vm14, %v955_v16, %v366_v13  ;;  %vm1095_vm9 = vmor %vm327_vm6, %vm328_vm7 }
  0xab   : > { %v334_v23 = vmul.f32 0.5, %v333_v12  ;;  %v313_v16 = vmul.f32 %v1000_v9, %v312_v21  ;;  %v413_v35 = vmul.f32 %v370_v26, %v853_v7  ;;  %v346_v42 = vmul.f32 %v960_v25, %v345_v53 }
  0xac   : > { %606 = vmatpush.xpose.msk.msra.mxu0 %vm176_vm0, %v415_v5  ;;  %687 = vrsqrt.f32 %v1011_v6  ;;  %v324_v33 = vmul.f32 0.5, %v323_v60  ;;  %vm317_vm10 = vweird.f32 %v965_v32  ;;  %vm318_vm11 = vweird.f32 %v1000_v9 }
  0xad   : > { %v188_v24 = vpop.xlane.xlu0 %187  ;;  %v185_v39 = vpop.xlane.xlu1 %184  ;;  %v335_v40 = vsub.f32 1.5, %v334_v23  ;;  %v314_v47 = vmul.f32 0.5, %v313_v16  ;;  %v350_v56 = vsel %vm1051_vm3, %v960_v25, %v346_v42  ;;  %vm1115_vm12 = vmor %vm317_vm10, %vm318_vm11  ;;  %vm307_vm13 = vweird.f32 %v975_v49 }
  0xae   : > { %v1029_v30 = vpop.eup %683  ;;  %v1042_v34 = vmax.f32 %v188_v24, 1e-24  ;;  %v1059_v46 = vmax.f32 %v185_v39, 1e-24  ;;  %v325_v50 = vsub.f32 1.5, %v324_v33  ;;  %v182_v55 = vpop.xlane.xlu2 %181  ;;  %v411_v15 = vmul.f32 %v350_v56, %v859_v11 }
  0xaf   : > { %v1039_v1 = vpop.eup %685  ;;  %v302_v41 = vmul.f32 %v1029_v30, %v975_v49  ;;  %v336_v59 = vmul.f32 %v970_v44, %v335_v40  ;;  %v1086_v57 = vmax.f32 %v182_v55, 1e-24  ;;  %v315_v63 = vsub.f32 1.5, %v314_v47 }
  0xb0   : > { %607 = vmatpush.xpose.msk.msra.mxu0 %vm176_vm0, %v414_v22  ;;  %v292_v7 = vmul.f32 %v1039_v1, %v984_v0  ;;  %689 = vrsqrt.f32 %v1042_v34  ;;  %v326_v14 = vmul.f32 %v977_v52, %v325_v50  ;;  %vm308_vm14 = vweird.f32 %v1029_v30 }
  0xb1   : > { %v303_v54 = vmul.f32 %v1029_v30, %v302_v41  ;;  %691 = vrsqrt.f32 %v1059_v46  ;;  %v340_v8 = vsel %vm1080_vm8, %v970_v44, %v336_v59  ;;  %v316_v22 = vmul.f32 %v1000_v9, %v315_v63  ;;  %vm1131_vm15 = vmor %vm307_vm13, %vm308_vm14 }
  0xb2   : > { %v1064_v48 = vpop.eup %687  ;;  %v293_v2 = vmul.f32 %v1039_v1, %v292_v7  ;;  %693 = vrsqrt.f32 %v1086_v57  ;;  %v410_v13 = vmul.f32 %v340_v8, %v871_v18  ;;  %v330_v32 = vsel %vm1095_vm9, %v977_v52, %v326_v14 }
  0xb3   : > { %v282_v25 = vmul.f32 %v1064_v48, %v1011_v6  ;;  %v304_v3 = vmul.f32 0.5, %v303_v54  ;;  %v409_v52 = vmul.f32 %v330_v32, %v874_v19  ;;  %v320_v58 = vsel %vm1115_vm12, %v1000_v9, %v316_v22 }
  0xb4   : > { %608 = vmatpush.xpose.msk.msra.mxu0 %vm176_vm0, %v413_v35  ;;  %v294_v11 = vmul.f32 0.5, %v293_v2  ;;  %vm297_vm1 = vweird.f32 %v984_v0  ;;  %vm298_vm2 = vweird.f32 %v1039_v1  ;;  %v408_v35 = vmul.f32 %v320_v58, %v877_v20 }
  0xb5   : > { %v179_v5 = vpop.xlane.xlu0 %178  ;;  %v283_v51 = vmul.f32 %v1064_v48, %v282_v25  ;;  %v305_v60 = vsub.f32 1.5, %v304_v3  ;;  %vm1145_vm3 = vmor %vm297_vm1, %vm298_vm2  ;;  %vm287_vm4 = vweird.f32 %v1011_v6  ;;  %vm288_vm5 = vweird.f32 %v1064_v48 }
  0xb6   : > { %v1093_v10 = vpop.eup %689  ;;  %v1104_v44 = vmax.f32 %v179_v5, 1e-24  ;;  %v295_v24 = vsub.f32 1.5, %v294_v11  ;;  %vm289_vm6 = vmor %vm287_vm4, %vm288_vm5  ;;  %vm277_vm7 = vweird.f32 %v1042_v34  ;;  %vm267_vm10 = vweird.f32 %v1059_v46  ;;  %v417_v5 = vld [vmem:[%s1218_s0] sm:$0x7] }
  0xb7   : > { %v1107_v17 = vpop.eup %691  ;;  %v272_v21 = vmul.f32 %v1093_v10, %v1042_v34  ;;  %v284_v18 = vmul.f32 0.5, %v283_v51  ;;  %v306_v31 = vmul.f32 %v1029_v30, %v305_v60  ;;  %vm278_vm8 = vweird.f32 %v1093_v10 }
  0xb8   : > { %609 = vmatpush.xpose.msk.msra.mxu0 %vm176_vm0, %v412_v4  ;;  %v262_v23 = vmul.f32 %v1107_v17, %v1059_v46  ;;  %695 = vrsqrt.f32 %v1104_v44  ;;  %v694_v49 = vpop.eup %693  ;;  %v296_v41 = vmul.f32 %v1039_v1, %v295_v24  ;;  %vm279_vm9 = vmor %vm277_vm7, %vm278_vm8  ;;  %vm268_vm11 = vweird.f32 %v1107_v17 }
  0xb9   : > { %v273_v26 = vmul.f32 %v1093_v10, %v272_v21  ;;  %v285_v19 = vsub.f32 1.5, %v284_v18  ;;  %v252_v9 = vmul.f32 %v694_v49, %v1086_v57  ;;  %v310_v40 = vsel %vm1131_vm15, %v1029_v30, %v306_v31  ;;  %vm269_vm12 = vmor %vm267_vm10, %vm268_vm11 }
  0xba   : > { %v263_v16 = vmul.f32 %v1107_v17, %v262_v23  ;;  %v407_v0 = vmul.f32 %v310_v40, %v889_v27  ;;  %v300_v4 = vsel %vm1145_vm3, %v1039_v1, %v296_v41  ;;  %vm257_vm13 = vweird.f32 %v1086_v57 }
  0xbb   : > { %v274_v39 = vmul.f32 0.5, %v273_v26  ;;  %v286_v43 = vmul.f32 %v1064_v48, %v285_v19  ;;  %v253_v30 = vmul.f32 %v694_v49, %v252_v9  ;;  %v406_v27 = vmul.f32 %v300_v4, %v892_v28 }
  0xbc   : > { %610 = vmatpush.xpose.msk.msra.mxu0 %vm176_vm0, %v411_v15  ;;  %v264_v20 = vmul.f32 0.5, %v263_v16  ;;  %vm258_vm14 = vweird.f32 %v694_v49  ;;  %vm247_vm1 = vweird.f32 %v1104_v44  ;;  %vm489_vm4 = vcmask 1042432  }
  0xbd   : > { %v275_v7 = vsub.f32 1.5, %v274_v39  ;;  %v254_v50 = vmul.f32 0.5, %v253_v30  ;;  %v290_v55 = vsel %vm289_vm6, %v1064_v48, %v286_v43  ;;  %vm259_vm15 = vmor %vm257_vm13, %vm258_vm14 }
  0xbe   : > { %v696_v62 = vpop.eup %695  ;;  %v265_v6 = vsub.f32 1.5, %v264_v20  ;;  %v405_v1 = vmul.f32 %v290_v55, %v895_v29 }
  0xbf   : > { %v242_v47 = vmul.f32 %v696_v62, %v1104_v44  ;;  %v276_v56 = vmul.f32 %v1093_v10, %v275_v7  ;;  %v255_v59 = vsub.f32 1.5, %v254_v50  ;;  %vm248_vm2 = vweird.f32 %v696_v62 }
  0xc0   : > { %611 = vmatpush.xpose.msk.msra.mxu0 %vm176_vm0, %v410_v13  ;;  %v266_v34 = vmul.f32 %v1107_v17, %v265_v6  ;;  %vm249_vm3 = vmor %vm247_vm1, %vm248_vm2 }
  0xc1   : > { %v243_v54 = vmul.f32 %v696_v62, %v242_v47  ;;  %v280_v28 = vsel %vm279_vm9, %v1093_v10, %v276_v56  ;;  %v256_v61 = vmul.f32 %v694_v49, %v255_v59 }
  0xc2   : > { %v404_v48 = vmul.f32 %v280_v28, %v907_v36  ;;  %v270_v25 = vsel %vm269_vm12, %v1107_v17, %v266_v34 }
  0xc3   : > { %v244_v2 = vmul.f32 0.5, %v243_v54  ;;  %v403_v29 = vmul.f32 %v270_v25, %v910_v37  ;;  %v260_v63 = vsel %vm259_vm15, %v694_v49, %v256_v61 }
  0xc4   : > { %612 = vmatpush.xpose.msk.msra.mxu0 %vm176_vm0, %v409_v52  ;;  %v402_v57 = vmul.f32 %v260_v63, %v913_v38 }
  0xc5   : > { %v245_v46 = vsub.f32 1.5, %v244_v2 }
  0xc7   : > { %v246_v15 = vmul.f32 %v696_v62, %v245_v46 }
  0xc8   : > { %613 = vmatpush.xpose.msk.msra.mxu0 %vm176_vm0, %v408_v35 }
  0xc9   : > { %v250_v36 = vsel %vm249_vm3, %v696_v62, %v246_v15 }
  0xca   : > { %v401_v3 = vmul.f32 %v250_v36, %v925_v45 }
  0xcc   : > { %614 = vmatpush.xpose.msk.msra.mxu0 %vm176_vm0, %v407_v0 }
  0xd0   : > { %615 = vmatpush.xpose.msk.msra.mxu0 %vm176_vm0, %v406_v27 }
  0xd4   : > { %616 = vmatpush.xpose.msk.msra.mxu0 %vm176_vm0, %v405_v1 }
  0xd8   : > { %617 = vmatpush.xpose.msk.msra.mxu0 %vm176_vm0, %v404_v48 }
  0xdc   : > { %618 = vmatpush.xpose.msk.msra.mxu0 %vm176_vm0, %v403_v29 }
  0xe0   : > { %619 = vmatpush.xpose.msk.msra.mxu0 %vm176_vm0, %v402_v57 }
  0xe4   : > { %620 = vmatpush.xpose.msk.msra.mxu0 %vm176_vm0, %v401_v3 }
  0xe7   : > { %621 = vmatmul.msk.f32.vlgmr.msra.gmra.mxu0 %vm176_vm0, %v417_v5 }
 0x164   : > { %v486_v37 = vpop.f32.mrf.mxu0 }
 0x165   : > { %v490_v8 = vsel %vm489_vm4, %v486_v37, -inf }
 0x166   : > { %v491_v14 = vrot.slane %v490_v8, 4 }
 0x168   : > { %v492_v10 = vmax.f32 %v490_v8, %v491_v14 }
 0x16a   : > { %v493_v12 = vrot.slane %v492_v10, 2 }
 0x16c   : > { %v494_v38 = vmax.f32 %v492_v10, %v493_v12 }
 0x16e   : > { %v495_v11 = vrot.slane %v494_v38, 1 }
 0x170   : > { %v496_v51 = vmax.f32 %v494_v38, %v495_v11 }
 0x172   : > { %v497_v44 = vsub.f32 %v486_v37, %v496_v51 }
 0x174   : > { %v498_v45 = vmul.f32 1.442695, %v497_v44 }
 0x176   : > { %697 = vpow2.f32 %v498_v45 }
 0x17c   : > { %v698_v13 = vpop.eup %697 }
 0x17d   : > { %v500_v17 = vsel %vm489_vm4, %v698_v13, 0.0 }
 0x17e   : > { %v501_v60 = vrot.slane %v500_v17, 4 }
 0x180   : > { %v502_v21 = vadd.f32 %v501_v60, %v500_v17 }
 0x182   : > { %v503_v32 = vrot.slane %v502_v21, 2 }
 0x184   : > { %v504_v22 = vadd.f32 %v503_v32, %v502_v21 }
 0x186   : > { %v505_v53 = vrot.slane %v504_v22, 1 }
 0x188   : > { %v506_v18 = vadd.f32 %v505_v53, %v504_v22 }
 0x18a   : > { %699 = vrcp.f32 %v506_v18  ;;  %v518_v26 = vand.u32 2147483648, %v506_v18  ;;  %v516_v31 = vand.u32 2147483647, %v506_v18  ;;  %vm512_vm5 = vweird.f32 %v506_v18 }
 0x18c   : > { %v519_v33 = vor.u32 1.1754944e-38, %v518_v26  ;;  %vm517_vm7 = vcmp.eq.f32.partialorder %v516_v31, 8.507059e+37 }
 0x190   : > { %v700_v23 = vpop.eup %699 }
 0x191   : > { %v508_v52 = vmul.f32 %v700_v23, %v506_v18  ;;  %vm513_vm0 = vweird.f32 %v700_v23 }
 0x192   : > { %vm514_vm6 = vmor %vm512_vm5, %vm513_vm0 }
 0x193   : > { %v509_v24 = vsub.f32 1.0, %v508_v52 }
 0x195   : > { %v510_v58 = vmul.f32 %v700_v23, %v509_v24 }
 0x197   : > { %v511_v49 = vadd.f32 %v700_v23, %v510_v58 }
 0x199   : > { %v515_v19 = vsel %vm514_vm6, %v700_v23, %v511_v49 }
 0x19a   : > { %v520_v16 = vsel %vm517_vm7, %v519_v33, %v515_v19 }
 0x19b   : > { %v521_v35 = vmul.f32 %v698_v13, %v520_v16 }
 0x19d   : > { %522 = vst [vmem:[%s137_s6] sm:$0x7] %v521_v35 }
 0x19e   : > { %728 = shalt.err (!%p725_p3)
}
 0x19f   : > { %626 = dma.vmem_to_hbm [thread:$0]  (%p818_p5), %s537_s7, 64, %s539_s8, %s524_s13  }
 0x1a0 PF: > { %p632_p4 = scmp.ge.s32.totalorder %s763_s12, 2  ;;  %s550_s25 = sand.u32 1, %s751_s9  }
 0x1a1   : > { %s551_s26 = scalar_lea.sflag [#allocation3], %s550_s25 }
 0x1a2   : > { %p629_p7 = pnand %p632_p4, %p822_p6 }
 0x1a4   : > { %p630_p8 = pneg %p629_p7 }
 0x1a6   : > { %746 = dma.done.wait (%p630_p8), %s551_s26, 64  }
 0x1a7   : > { %748 = vsyncadd (%p630_p8), %s551_s26, 4294967232  ;;  %p12_p9 = scmp.ge.s32.totalorder %s805_s15, 4   ;;  %s1241_s9 = smov %s755_s10 }
 0x1a8   : > { %s1242_s10 = smov %s759_s11  ;;  %s1243_s11 = smov %s816_s18 }
 0x1a9   : > { %s1244_s12 = smov %s805_s15  ;;  %14 = sbr.rel (!%p12_p9) target bundleno = 3 (0x3), region = 63 }
 0x1ae   :  { %557 = vsyncpa [#allocation3], 1 }
 0x1af   :  { %559 = vsyncpa [#allocation3 + $0x1], 1 }

</bundles_post_ra>
